<compile_context>
chip_gen: v5e
topology: v5e:2x2
jax: 0.10.0
libtpu: 0.0.40
codegen_flags: <defaults>
</compile_context>

<pallas_src>
import functools

import jax
import jax.numpy as jnp
from jax.experimental import pallas as pl
from jax.experimental.pallas import tpu as pltpu

_LANE = 128
_TARGET_BLOCK_BYTES = 2 * 1024 * 1024  # ~2 MiB per input block (x2 for double buffering)


def _round_up(v: int, m: int) -> int:
    return ((v + m - 1) // m) * m


def _l_color_kernel(x_ref, o_ref, acc_ref, *, inv_n: float, n_rows: int,
                    r_tile: int, mask_rows: bool):
    # x_ref  : (B_TILE, 3, R_TILE, 128)   one row-tile of B_TILE images (VMEM)
    # o_ref  : (B_TILE, 1)                per-image loss, written on last tile
    # acc_ref: (B_TILE, 3, 128) f32       running per-channel partial sums
    t = pl.program_id(1)

    @pl.when(t == 0)
    def _init():
        acc_ref[...] = jnp.zeros_like(acc_ref)

    x = x_ref[...]
    if mask_rows:
        # Last row-tile may extend past the array (out-of-bounds rows are
        # unspecified) -> zero them before accumulating. Cheap VPU work that
        # hides under the HBM-bound DMA.
        rows = jax.lax.broadcasted_iota(jnp.int32, (r_tile, _LANE), 0) + t * r_tile
        x = jnp.where(rows < n_rows, x, jnp.zeros_like(x))

    # Sublane-axis reduce: plain vreg adds (VALU), accumulated in f32.
    acc_ref[...] += jnp.sum(x, axis=2, dtype=jnp.float32)  # (B_TILE, 3, 128)

    @pl.when(t == pl.num_programs(1) - 1)
    def _finalize():
        # Single cross-lane reduce per batch block, then the tiny loss math.
        mean_rgb = jnp.sum(acc_ref[...], axis=-1) * jnp.float32(inv_n)  # (B_TILE, 3)
        mr = mean_rgb[:, 0:1]
        mg = mean_rgb[:, 1:2]
        mb = mean_rgb[:, 2:3]
        d_rg = (mr - mg) ** 2
        d_rb = (mr - mb) ** 2
        d_gb = (mb - mg) ** 2
        k = jnp.sqrt(d_rg * d_rg + d_rb * d_rb + d_gb * d_gb)          # (B_TILE, 1)
        o_ref[...] = k.astype(o_ref.dtype)


def l_color(x: jax.Array, *, target_block_bytes: int = _TARGET_BLOCK_BYTES) -> jax.Array:
    """Pallas TPU implementation of L_color.forward: (b, 3, h, w) -> (b, 1, 1, 1)."""
    b, c, h, w = x.shape
    assert c == 3, "L_color expects RGB input (c == 3)"
    n = h * w
    inv_n = 1.0 / float(n)
    itemsize = jnp.dtype(x.dtype).itemsize

    # Fold the flattened spatial axis into (rows, 128). Pad with zeros to a
    # multiple of 128 only when required (zeros do not change channel sums; we
    # divide by the true h*w). Typical image sizes need no pad copy at all.
    n128 = _round_up(n, _LANE)
    x_flat = x.reshape(b, 3, n)
    if n128 != n:
        x_flat = jnp.pad(x_flat, ((0, 0), (0, 0), (0, n128 - n)))
    r = n128 // _LANE
    x4 = x_flat.reshape(b, 3, r, _LANE)

    # Row tiling: one full-extent tile if it fits the budget; otherwise
    # balanced tiles (multiple of 8 sublanes) with an in-kernel mask for the
    # possibly-partial last tile (no extra HBM padding copy).
    bytes_per_row = 3 * _LANE * itemsize
    max_rows = max(8, (target_block_bytes // bytes_per_row) // 8 * 8)
    if r <= max_rows:
        r_tile = r
        num_r_tiles = 1
        mask_rows = False
    else:
        num = pl.cdiv(r, max_rows)
        r_tile = _round_up(pl.cdiv(r, num), 8)
        num_r_tiles = pl.cdiv(r, r_tile)
        mask_rows = (r % r_tile) != 0

    # Batch blocking: amortize per-grid-step overhead for small images while
    # keeping each (double-buffered) input block around target_block_bytes.
    block_bytes = 3 * r_tile * _LANE * itemsize
    max_bt = max(1, target_block_bytes // block_bytes)
    b_tile = 1
    for d in range(min(b, max_bt), 0, -1):
        if b % d == 0:
            b_tile = d
            break

    kernel = functools.partial(
        _l_color_kernel, inv_n=inv_n, n_rows=r, r_tile=r_tile, mask_rows=mask_rows
    )

    out = pl.pallas_call(
        kernel,
        out_shape=jax.ShapeDtypeStruct((b, 1), x.dtype),
        grid_spec=pltpu.PrefetchScalarGridSpec(
            num_scalar_prefetch=0,
            grid=(b // b_tile, num_r_tiles),
            in_specs=[
                pl.BlockSpec((b_tile, 3, r_tile, _LANE), lambda i, t: (i, 0, t, 0)),
            ],
            out_specs=pl.BlockSpec((b_tile, 1), lambda i, t: (i, 0)),
            scratch_shapes=[pltpu.VMEM((b_tile, 3, _LANE), jnp.float32)],
        ),
        compiler_params=pltpu.CompilerParams(
            dimension_semantics=("parallel", "arbitrary"),
        ),
    )(x4)
    return out.reshape(b, 1, 1, 1)


def _l_color_ref(x: jax.Array) -> jax.Array:
    """Pure-JAX reference replicating the PyTorch semantics."""
    mean_rgb = jnp.mean(x, axis=(2, 3), keepdims=True)
    mr, mg, mb = mean_rgb[:, 0:1], mean_rgb[:, 1:2], mean_rgb[:, 2:3]
    d_rg = (mr - mg) ** 2
    d_rb = (mr - mb) ** 2
    d_gb = (mb - mg) ** 2
    return jnp.sqrt(d_rg ** 2 + d_rb ** 2 + d_gb ** 2)


if __name__ == "__main__":
    key = jax.random.PRNGKey(0)
    k1, k2, k3 = jax.random.split(key, 3)

    # 1) Small shape consistent with the module: batch=2, RGB, 16x16 spatial.
    #    Single tile, batch-blocked, no padding / masking.
    x1 = jax.random.uniform(k1, (2, 3, 16, 16), dtype=jnp.float32)
    out1 = jax.block_until_ready(l_color(x1))
    ref1 = _l_color_ref(x1)
    assert out1.shape == (2, 1, 1, 1)
    assert jnp.allclose(out1, ref1, atol=1e-5, rtol=1e-5)

    # 2) 40x40 spatial: n=1600 is not a multiple of 128 (pad-to-128 path) and a
    #    tiny block budget forces 2 row tiles with a partial, masked last tile.
    x2 = jax.random.uniform(k2, (4, 3, 40, 40), dtype=jnp.float32)
    out2 = jax.block_until_ready(l_color(x2, target_block_bytes=3 * 8 * 128 * 4))
    ref2 = _l_color_ref(x2)
    assert out2.shape == (4, 1, 1, 1)
    assert jnp.allclose(out2, ref2, atol=1e-5, rtol=1e-5)

    # 3) 64x64 spatial: exact multi-tile accumulation (no pad, no mask).
    x3 = jax.random.uniform(k3, (2, 3, 64, 64), dtype=jnp.float32)
    out3 = jax.block_until_ready(l_color(x3, target_block_bytes=3 * 16 * 128 * 4))
    ref3 = _l_color_ref(x3)
    assert out3.shape == (2, 1, 1, 1)
    assert jnp.allclose(out3, ref3, atol=1e-5, rtol=1e-5)

    print("KERNEL_OK")
</pallas_src>

<mosaic_0001>
module attributes {stable_mosaic.version = 11 : i64} {
  func.func @_l_color_kernel(%arg0: i32, %arg1: i32, %arg2: memref<2x3x2x128xf32, #tpu.memory_space<vmem>>, %arg3: memref<2x1xf32, #tpu.memory_space<vmem>>, %arg4: memref<2x3x128xf32, #tpu.memory_space<vmem>>) attributes {dimension_semantics = [#tpu.dimension_semantics<parallel>, #tpu.dimension_semantics<arbitrary>], iteration_bounds = array<i64: 1, 1>, scalar_prefetch = 0 : i64, scratch_operands = 1 : i64, tpu.core_type = #tpu.core_type<tc>, window_params = [{transform_indices = @transform_0, window_bounds = array<i64: 2, 3, 2, 128>}, {transform_indices = @transform_1, window_bounds = array<i64: 2, 1>}]} {
    %c0_i32 = arith.constant 0 : i32
    %0 = arith.cmpi eq, %arg1, %c0_i32 : i32
    %1 = arith.extui %0 : i1 to i32
    %c0_i32_0 = arith.constant 0 : i32
    %2 = arith.cmpi ne, %1, %c0_i32_0 : i32
    scf.if %2 {
      %cst_12 = arith.constant 0.000000e+00 : f32
      %11 = vector.broadcast %cst_12 : f32 to vector<2x3x128xf32>
      %c0_13 = arith.constant 0 : index
      %c0_14 = arith.constant 0 : index
      %c0_15 = arith.constant 0 : index
      %12 = vector.load %arg4[%c0_13, %c0_14, %c0_15] : memref<2x3x128xf32, #tpu.memory_space<vmem>>, vector<2x3x128xf32>
      tpu.vector_store %arg4[%c0_13, %c0_14, %c0_15], %11 {strides = array<i32>} : memref<2x3x128xf32, #tpu.memory_space<vmem>>, vector<2x3x128xf32>,
    } else {
    }
    %c0 = arith.constant 0 : index
    %c0_1 = arith.constant 0 : index
    %c0_2 = arith.constant 0 : index
    %c0_3 = arith.constant 0 : index
    %3 = vector.load %arg2[%c0, %c0_1, %c0_2, %c0_3] : memref<2x3x2x128xf32, #tpu.memory_space<vmem>>, vector<2x3x2x128xf32>
    %c0_4 = arith.constant 0 : index
    %c0_5 = arith.constant 0 : index
    %c0_6 = arith.constant 0 : index
    %4 = vector.load %arg4[%c0_4, %c0_5, %c0_6] : memref<2x3x128xf32, #tpu.memory_space<vmem>>, vector<2x3x128xf32>
    %cst = arith.constant dense<0.000000e+00> : vector<2x3x128xf32>
    %5 = vector.multi_reduction <add>, %3, %cst [2] : vector<2x3x2x128xf32> to vector<2x3x128xf32>
    %6 = arith.addf %4, %5 : vector<2x3x128xf32>
    %c0_7 = arith.constant 0 : index
    %c0_8 = arith.constant 0 : index
    %c0_9 = arith.constant 0 : index
    %7 = vector.load %arg4[%c0_7, %c0_8, %c0_9] : memref<2x3x128xf32, #tpu.memory_space<vmem>>, vector<2x3x128xf32>
    tpu.vector_store %arg4[%c0_7, %c0_8, %c0_9], %6 {strides = array<i32>} : memref<2x3x128xf32, #tpu.memory_space<vmem>>, vector<2x3x128xf32>,
    %c0_i32_10 = arith.constant 0 : i32
    %8 = arith.cmpi eq, %arg1, %c0_i32_10 : i32
    %9 = arith.extui %8 : i1 to i32
    %c0_i32_11 = arith.constant 0 : i32
    %10 = arith.cmpi ne, %9, %c0_i32_11 : i32
    scf.if %10 {
      %c0_12 = arith.constant 0 : index
      %c0_13 = arith.constant 0 : index
      %c0_14 = arith.constant 0 : index
      %11 = vector.load %arg4[%c0_12, %c0_13, %c0_14] : memref<2x3x128xf32, #tpu.memory_space<vmem>>, vector<2x3x128xf32>
      %cst_15 = arith.constant dense<0.000000e+00> : vector<2x3xf32>
      %12 = vector.multi_reduction <add>, %11, %cst_15 [2] : vector<2x3x128xf32> to vector<2x3xf32>
      %cst_16 = arith.constant 3.906250e-03 : f32
      %13 = vector.broadcast %cst_16 : f32 to vector<2x3xf32>
      %14 = arith.mulf %12, %13 : vector<2x3xf32>
      %15 = vector.extract_strided_slice %14 {offsets = [0, 0], sizes = [2, 1], strides = [1, 1]} : vector<2x3xf32> to vector<2x1xf32>
      %16 = vector.extract_strided_slice %14 {offsets = [0, 1], sizes = [2, 1], strides = [1, 1]} : vector<2x3xf32> to vector<2x1xf32>
      %17 = vector.extract_strided_slice %14 {offsets = [0, 2], sizes = [2, 1], strides = [1, 1]} : vector<2x3xf32> to vector<2x1xf32>
      %18 = arith.subf %15, %16 : vector<2x1xf32>
      %19 = arith.mulf %18, %18 : vector<2x1xf32>
      %20 = arith.subf %15, %17 : vector<2x1xf32>
      %21 = arith.mulf %20, %20 : vector<2x1xf32>
      %22 = arith.subf %17, %16 : vector<2x1xf32>
      %23 = arith.mulf %22, %22 : vector<2x1xf32>
      %24 = arith.mulf %19, %19 : vector<2x1xf32>
      %25 = arith.mulf %21, %21 : vector<2x1xf32>
      %26 = arith.addf %24, %25 : vector<2x1xf32>
      %27 = arith.mulf %23, %23 : vector<2x1xf32>
      %28 = arith.addf %26, %27 : vector<2x1xf32>
      %29 = math.sqrt %28 : vector<2x1xf32>
      %c0_17 = arith.constant 0 : index
      %c0_18 = arith.constant 0 : index
      %30 = vector.load %arg3[%c0_17, %c0_18] : memref<2x1xf32, #tpu.memory_space<vmem>>, vector<2x1xf32>
      tpu.vector_store %arg3[%c0_17, %c0_18], %29 {strides = array<i32>} : memref<2x1xf32, #tpu.memory_space<vmem>>, vector<2x1xf32>,
    } else {
    }
    return
  }
  func.func @transform_0(%arg0: i32, %arg1: i32) -> (i32, i32, i32, i32) {
    %c0_i32 = arith.constant 0 : i32
    %c0_i32_0 = arith.constant 0 : i32
    %c0_i32_1 = arith.constant 0 : i32
    return %arg0, %c0_i32, %arg1, %c0_i32_0 : i32, i32, i32, i32
  }
  func.func @transform_1(%arg0: i32, %arg1: i32) -> (i32, i32) {
    %c0_i32 = arith.constant 0 : i32
    %c0_i32_0 = arith.constant 0 : i32
    return %arg0, %c0_i32 : i32, i32
  }
}

</mosaic_0001>

<bundles_post_ra>
// kernel: tpu_custom_call.1
= control target key start
LH: loop header
LB: loop body
LE: loop exit
PB: predicated region body
PF: predicated region fallthrough
CT: control target
= control target key end

     0   :  { %6 = vsyncpa [#allocation4], 0  ;;  %s225_s9 = smov [#allocation3]   ;;  %s226_s11 = smov 32   ;;  %s256_s0 = inlined_call_operand.hbm [shape: f32[2,3,2,128], index: 0, kind: input, shape index: {}]   ;;  %s257_s1 = inlined_call_operand.vmem [shape: f32[2,1], index: 1, kind: output, shape index: {}]  }
   0x1   :  { %s11_s8 = sshll.u32 %s256_s0, 4  ;;  %s13_s10 = sshll.u32 %s225_s9, 4  ;;  %s12_s8 = int_to_ptr.hbm [resolvable:$true] %s11_s8  ;;  %s14_s10 = int_to_ptr.vmem [resolvable:$true] %s13_s10 }
   0x2   :  { %s227_s12 = smov 2  }
   0x3   :  { %19 = dma.hbm_to_vmem [thread:$0]  %s12_s8, 192, %s14_s10, [#allocation4], %s226_s11, %s226_s11, %s227_s12  }
   0x4   :  { %223 = dma.done.wait [#allocation4], 192  }
   0x5   :  { %224 = vsyncadd [#allocation4], 4294967104  ;;  %v228_v0 = vmov 0.0   ;;  %vm38_vm0 = vcmask 1041408   ;;  %v33_v1 = vld [vmem:[#allocation3 + $0x6] sm:$0x3] }
   0x6   :  { %29 = vst [vmem:[#allocation2 + $0x4] sm:$0x7] %v228_v0  ;;  %v34_v2 = vld [vmem:[#allocation3 + $0x8] sm:$0x3]  ;;  %v35_v3 = vld [vmem:[#allocation3 + $0xa] sm:$0x3] }
   0x7   :  { %28 = vst [vmem:[#allocation2] sm:$0x7] %v228_v0  ;;  %v60_v4 = vsel %vm38_vm0, %v33_v1, 0.0  ;;  %v67_v5 = vsel %vm38_vm0, %v34_v2, 0.0  ;;  %v74_v6 = vsel %vm38_vm0, %v35_v3, 0.0  ;;  %vm87_vm1 = vcmask 1041409  }
   0x8   :  { %v61_v7 = vrot.slane %v60_v4, 4  ;;  %v68_v8 = vrot.slane %v67_v5, 4  ;;  %v75_v9 = vrot.slane %v74_v6, 4  ;;  %v30_v10 = vld [vmem:[#allocation3] sm:$0x3]  ;;  %vm89_vm2 = vcmask 1042434  }
   0x9   :  { %v31_v11 = vld [vmem:[#allocation3 + $0x2] sm:$0x3]  ;;  %v32_v12 = vld [vmem:[#allocation3 + $0x4] sm:$0x3]  ;;  %v39_v16 = vsel %vm38_vm0, %v30_v10, 0.0  ;;  %vm104_vm3 = vcmask 1042432  }
   0xa   :  { %v62_v13 = vadd.f32 %v61_v7, %v60_v4  ;;  %v69_v14 = vadd.f32 %v68_v8, %v67_v5  ;;  %v76_v15 = vadd.f32 %v75_v9, %v74_v6  ;;  %v40_v17 = vrot.slane %v39_v16, 4 }
   0xb   :  { %v46_v18 = vsel %vm38_vm0, %v31_v11, 0.0  ;;  %v53_v19 = vsel %vm38_vm0, %v32_v12, 0.0  ;;  %vm184_vm7 = vcmask 1024  }
   0xc   :  { %v63_v20 = vrot.slane %v62_v13, 2  ;;  %v70_v21 = vrot.slane %v69_v14, 2  ;;  %v77_v22 = vrot.slane %v76_v15, 2  ;;  %v47_v23 = vrot.slane %v46_v18, 4 }
   0xd   :  { %v41_v24 = vadd.f32 %v40_v17, %v39_v16  ;;  %v54_v25 = vrot.slane %v53_v19, 4  ;;  %v37_v42 = vld [vmem:[#allocation2 + $0x4] sm:$0x7] }
   0xe   :  { %v64_v26 = vadd.f32 %v63_v20, %v62_v13  ;;  %v71_v27 = vadd.f32 %v70_v21, %v69_v14  ;;  %v78_v28 = vadd.f32 %v77_v22, %v76_v15  ;;  %v48_v29 = vadd.f32 %v47_v23, %v46_v18  ;;  %v36_v52 = vld [vmem:[#allocation2] sm:$0x7] }
   0xf   :  { %v42_v30 = vrot.slane %v41_v24, 2  ;;  %v55_v31 = vadd.f32 %v54_v25, %v53_v19 }
  0x10   :  { %v65_v32 = vrot.slane %v64_v26, 1  ;;  %v72_v33 = vrot.slane %v71_v27, 1  ;;  %v79_v34 = vrot.slane %v78_v28, 1  ;;  %v49_v35 = vrot.slane %v48_v29, 2 }
  0x11   :  { %v43_v36 = vadd.f32 %v42_v30, %v41_v24  ;;  %v56_v37 = vrot.slane %v55_v31, 2 }
  0x12   :  { %v66_v38 = vadd.f32 %v65_v32, %v64_v26  ;;  %v73_v39 = vadd.f32 %v72_v33, %v71_v27  ;;  %v80_v40 = vadd.f32 %v79_v34, %v78_v28  ;;  %v50_v41 = vadd.f32 %v49_v35, %v48_v29 }
  0x13   :  { %v44_v43 = vrot.slane %v43_v36, 1  ;;  %v57_v44 = vadd.f32 %v56_v37, %v55_v31 }
  0x14   :  { %v91_v45 = vsel %vm87_vm1, %v73_v39, %v66_v38  ;;  %v51_v46 = vrot.slane %v50_v41, 1 }
  0x15   :  { %v92_v47 = vsel %vm89_vm2, %v80_v40, %v91_v45  ;;  %v45_v48 = vadd.f32 %v44_v43, %v43_v36  ;;  %v58_v49 = vrot.slane %v57_v44, 1 }
  0x16   :  { %v96_v50 = vadd.f32 %v92_v47, %v37_v42  ;;  %v52_v51 = vadd.f32 %v51_v46, %v50_v41 }
  0x17   :  { %v59_v53 = vadd.f32 %v58_v49, %v57_v44 }
  0x18   :  { %98 = vst [vmem:[#allocation2 + $0x4] sm:$0x7] %v96_v50  ;;  %v88_v54 = vsel %vm87_vm1, %v52_v51, %v45_v48 }
  0x19   :  { %v90_v55 = vsel %vm89_vm2, %v59_v53, %v88_v54 }
  0x1a   :  { %v95_v56 = vadd.f32 %v90_v55, %v36_v52 }
  0x1c   :  { %97 = vst [vmem:[#allocation2] sm:$0x7] %v95_v56 }
  0x1f   :  { %v103_v57 = vld [vmem:[#allocation2 + $0x4] sm:$0x7] }
  0x20   :  { %v108_v58 = vsel %vm104_vm3, %v103_v57, 0.0 }
  0x21   :  { %109 = vadd.xlane.f32.xlu0 %v108_v58 }
  0x23   :  { %v102_v59 = vld [vmem:[#allocation2] sm:$0x7] }
  0x24   :  { %v105_v60 = vsel %vm104_vm3, %v102_v59, 0.0 }
  0x29   :  { %106 = vadd.xlane.f32.xlu0 %v105_v60 }
  0x94   :  { %v110_v61 = vpop.xlane.xlu0 %109 }
  0x95   :  { %v112_v62 = vmul.f32 0.00390625, %v110_v61 }
  0x97   :  { %v116_v63 = vrot.slane %v112_v62, 1  ;;  %v124_v0 = vrot.slane %v112_v62, 2  ;;  %v132_v1 = vrot.slane %v112_v62, 7 }
  0x99   :  { %v120_v2 = vsub.f32 %v112_v62, %v116_v63  ;;  %v128_v3 = vsub.f32 %v112_v62, %v124_v0  ;;  %v136_v4 = vsub.f32 %v112_v62, %v132_v1 }
  0x9b   :  { %v122_v5 = vmul.f32 %v120_v2, %v120_v2  ;;  %v130_v6 = vmul.f32 %v128_v3, %v128_v3  ;;  %v138_v7 = vmul.f32 %v136_v4, %v136_v4 }
  0x9c   :  { %v107_v8 = vpop.xlane.xlu0 %106 }
  0x9d   :  { %v140_v9 = vmul.f32 %v122_v5, %v122_v5  ;;  %v142_v10 = vmul.f32 %v130_v6, %v130_v6  ;;  %v146_v11 = vmul.f32 %v138_v7, %v138_v7  ;;  %v111_v12 = vmul.f32 0.00390625, %v107_v8 }
  0x9f   :  { %v144_v13 = vadd.f32 %v142_v10, %v140_v9  ;;  %v150_v14 = vrot.slane %v146_v11, 2  ;;  %v115_v15 = vrot.slane %v111_v12, 1  ;;  %v123_v16 = vrot.slane %v111_v12, 2 }
  0xa0   :  { %v131_v17 = vrot.slane %v111_v12, 7 }
  0xa1   :  { %v154_v18 = vadd.f32 %v150_v14, %v144_v13  ;;  %v119_v19 = vsub.f32 %v111_v12, %v115_v15  ;;  %v127_v20 = vsub.f32 %v111_v12, %v123_v16 }
  0xa2   :  { %v135_v21 = vsub.f32 %v111_v12, %v131_v17 }
  0xa3   :  { %195 = vrsqrt.f32 %v154_v18  ;;  %v121_v22 = vmul.f32 %v119_v19, %v119_v19  ;;  %v129_v23 = vmul.f32 %v127_v20, %v127_v20  ;;  %vm174_vm4 = vcmp.eq.f32.partialorder %v154_v18, inf }
  0xa4   :  { %v137_v24 = vmul.f32 %v135_v21, %v135_v21  ;;  %v177_v44 = vand.u32 2147483648, %v154_v18  ;;  %vm176_vm5 = vcmp.eq.f32.partialorder %v154_v18, 0.0 }
  0xa5   :  { %v139_v25 = vmul.f32 %v121_v22, %v121_v22  ;;  %v141_v26 = vmul.f32 %v129_v23, %v129_v23 }
  0xa6   :  { %v145_v27 = vmul.f32 %v137_v24, %v137_v24 }
  0xa7   :  { %v143_v28 = vadd.f32 %v141_v26, %v139_v25 }
  0xa8   :  { %v149_v29 = vrot.slane %v145_v27, 2 }
  0xa9   :  { %v196_v30 = vpop.eup %195 }
  0xaa   :  { %v168_v31 = vmul.f32 %v196_v30, %v154_v18  ;;  %v153_v32 = vadd.f32 %v149_v29, %v143_v28 }
  0xac   :  { %v169_v33 = vmul.f32 %v196_v30, %v168_v31  ;;  %197 = vrsqrt.f32 %v153_v32  ;;  %vm162_vm6 = vcmp.eq.f32.partialorder %v153_v32, inf  ;;  %v165_v48 = vand.u32 2147483648, %v153_v32 }
  0xad   :  { %vm164_vm8 = vcmp.eq.f32.partialorder %v153_v32, 0.0 }
  0xae   :  { %v170_v34 = vmul.f32 0.5, %v169_v33 }
  0xb0   :  { %v171_v35 = vsub.f32 1.5, %v170_v34 }
  0xb2   :  { %v198_v36 = vpop.eup %197  ;;  %v172_v37 = vmul.f32 %v196_v30, %v171_v35 }
  0xb3   :  { %v156_v38 = vmul.f32 %v198_v36, %v153_v32 }
  0xb4   :  { %v173_v39 = vmul.f32 %v172_v37, %v154_v18 }
  0xb5   :  { %v157_v40 = vmul.f32 %v198_v36, %v156_v38 }
  0xb6   :  { %v175_v42 = vsel %vm174_vm4, %v154_v18, %v173_v39 }
  0xb7   :  { %v158_v41 = vmul.f32 0.5, %v157_v40  ;;  %v178_v46 = vsel %vm176_vm5, %v177_v44, %v175_v42 }
  0xb8   :  { %v181_v49 = vrot.slane %v178_v46, 7 }
  0xb9   :  { %v159_v43 = vsub.f32 1.5, %v158_v41 }
  0xbb   :  { %v160_v45 = vmul.f32 %v198_v36, %v159_v43 }
  0xbd   :  { %v161_v47 = vmul.f32 %v160_v45, %v153_v32 }
  0xbf   :  { %v163_v50 = vsel %vm162_vm6, %v153_v32, %v161_v47 }
  0xc0   :  { %v166_v51 = vsel %vm164_vm8, %v165_v48, %v163_v50 }
  0xc1   :  { %v182_v52 = vsel %vm87_vm1, %v181_v49, %v166_v51 }
  0xc2   :  { %185 = vst.msk [vmem:[%s257_s1] sm:$0x3] %vm184_vm7, %v182_v52 }
  0xc3   :  { %190 = vsyncpa [#allocation4], 1 }

</bundles_post_ra>
